<compile_context>
chip_gen: v6e
topology: v6e:2x2x1
jax: 0.10.0
libtpu: 0.0.40
codegen_flags: <defaults>
</compile_context>

<pallas_src>
import jax
import jax.numpy as jnp
from jax.experimental import pallas as pl
from jax.experimental.pallas import tpu as pltpu

LANES = 128              # TPU lane width
SUBLANES = 8             # f32 sublane count per vreg
MAX_BLOCK_ROWS = 2048    # 2048 x 128 x 4 B = 1 MiB per f32 input buffer
PAD_LOGIT = -1e9         # padded (logit, target=0) gives exactly-zero BCE loss
PAD_TARGET = 0.0


def _bce_loss_kernel(x_ref, t_ref, loss_ref):
    """Elementwise, numerically-stable BCE-with-logits for one block."""
    x = x_ref[...].astype(jnp.float32)
    t = t_ref[...].astype(jnp.float32)
    # PyTorch's stable formulation: max(x,0) - x*t + log1p(exp(-|x|))
    loss_ref[...] = jnp.maximum(x, 0.0) - x * t + jnp.log1p(jnp.exp(-jnp.abs(x)))


def _bce_sum_kernel(x_ref, t_ref, partial_ref):
    """BCE-with-logits + per-block (8, 128) partial sum (no loss writeback)."""
    x = x_ref[...].astype(jnp.float32)
    t = t_ref[...].astype(jnp.float32)
    loss = jnp.maximum(x, 0.0) - x * t + jnp.log1p(jnp.exp(-jnp.abs(x)))
    # (block_rows, 128) -> (block_rows//8, 8, 128) is a no-op relayout of the
    # native (8, 128) VMEM tiling; the axis-0 reduce is pure cross-vreg VPU
    # adds (no XLU cross-lane work, no serial SMEM accumulator), so the grid
    # axis can stay "parallel".
    partial_ref[...] = loss.reshape(-1, SUBLANES, LANES).sum(axis=0)


def _flatten_and_pad(logits, target):
    """Flatten to (total_rows, 128) with zero-loss padding; pick block size."""
    n = logits.size
    rows = -(-n // LANES)                       # ceil(n / 128)
    rows = -(-rows // SUBLANES) * SUBLANES      # round up to multiple of 8
    block_rows = min(MAX_BLOCK_ROWS, rows)
    total_rows = -(-rows // block_rows) * block_rows
    pad = total_rows * LANES - n

    x = jnp.pad(logits.reshape(-1), (0, pad), constant_values=PAD_LOGIT)
    t = jnp.pad(target.reshape(-1), (0, pad), constant_values=PAD_TARGET)
    return (x.reshape(total_rows, LANES), t.reshape(total_rows, LANES),
            block_rows, total_rows, n)


_COMPILER_PARAMS = pltpu.CompilerParams(
    dimension_semantics=("parallel",),
    vmem_limit_bytes=32 * 1024 * 1024,
)


def bce_elementwise_pallas(logits, target):
    """Returns the flat per-element BCE-with-logits losses, shape [N]."""
    x2, t2, block_rows, total_rows, n = _flatten_and_pad(logits, target)
    grid = total_rows // block_rows

    loss = pl.pallas_call(
        _bce_loss_kernel,
        out_shape=jax.ShapeDtypeStruct((total_rows, LANES), jnp.float32),
        grid_spec=pltpu.PrefetchScalarGridSpec(
            num_scalar_prefetch=0,
            grid=(grid,),
            in_specs=[
                pl.BlockSpec((block_rows, LANES), lambda i: (i, 0)),
                pl.BlockSpec((block_rows, LANES), lambda i: (i, 0)),
            ],
            out_specs=pl.BlockSpec((block_rows, LANES), lambda i: (i, 0)),
        ),
        compiler_params=_COMPILER_PARAMS,
    )(x2, t2)
    return loss.reshape(-1)[:n]


def bce_sum_pallas(logits, target):
    """Returns (total BCE-with-logits sum over real elements, element count)."""
    x2, t2, block_rows, total_rows, n = _flatten_and_pad(logits, target)
    grid = total_rows // block_rows

    partials = pl.pallas_call(
        _bce_sum_kernel,
        out_shape=jax.ShapeDtypeStruct((grid, SUBLANES, LANES), jnp.float32),
        grid_spec=pltpu.PrefetchScalarGridSpec(
            num_scalar_prefetch=0,
            grid=(grid,),
            in_specs=[
                pl.BlockSpec((block_rows, LANES), lambda i: (i, 0)),
                pl.BlockSpec((block_rows, LANES), lambda i: (i, 0)),
            ],
            out_specs=pl.BlockSpec((None, SUBLANES, LANES),
                                   lambda i: (i, 0, 0)),
        ),
        compiler_params=_COMPILER_PARAMS,
    )(x2, t2)
    return jnp.sum(partials), n


class BootstrappedBCE:
    """JAX/Pallas port of the PyTorch BootstrappedBCE module."""

    def __init__(self, start_warm, end_warm, top_p):
        self.start_warm = start_warm
        self.end_warm = end_warm
        self.top_p = top_p

    def __call__(self, input, target, cur_epoch):
        if cur_epoch < self.start_warm:
            # F.binary_cross_entropy_with_logits(..., reduction='mean')
            # Sum-only kernel: skips the N x 4 B loss-slab HBM writeback.
            total, n = bce_sum_pallas(input, target)
            return total / jnp.float32(n)

        raw_loss = bce_elementwise_pallas(input, target)
        num_pixels = raw_loss.shape[0]

        if cur_epoch > self.end_warm:
            this_p = self.top_p
        else:
            this_p = self.top_p + (1 - self.top_p) * (
                (self.end_warm - cur_epoch) / (self.end_warm - self.start_warm)
            )
        k = max(1, int(num_pixels * this_p))
        # TODO(synk): torch.topk has no clean Pallas TPU primitive; for large
        # inputs a two-pass in-kernel threshold/histogram + masked-sum would
        # avoid this O(N log N) sort, but here we use jax.lax.top_k.
        topk_vals, _ = jax.lax.top_k(raw_loss, k)
        return jnp.mean(topk_vals)


if __name__ == "__main__":
    key = jax.random.PRNGKey(0)
    kx, kt = jax.random.split(key)

    # Small NCHW shapes consistent with a segmentation-style BCE loss.
    B, C, H, W = 2, 4, 16, 16
    logits = jax.random.normal(kx, (B, C, H, W), dtype=jnp.float32)
    target = jax.random.bernoulli(kt, p=0.5, shape=(B, C, H, W)).astype(
        jnp.float32
    )

    loss_fn = BootstrappedBCE(start_warm=1, end_warm=5, top_p=0.25)

    # Warm-up branch (plain mean over all pixels).
    loss_warm = loss_fn(logits, target, cur_epoch=0)
    # Bootstrapped branch (interpolated top-p fraction of hardest pixels).
    loss_boot = loss_fn(logits, target, cur_epoch=3)
    # Fully bootstrapped branch (top_p only).
    loss_full = loss_fn(logits, target, cur_epoch=10)

    jax.block_until_ready((loss_warm, loss_boot, loss_full))

    # Lightweight correctness check against a pure-JAX reference.
    ref_raw = (jnp.maximum(logits, 0.0) - logits * target
               + jnp.log1p(jnp.exp(-jnp.abs(logits)))).reshape(-1)
    assert jnp.allclose(loss_warm, ref_raw.mean(), rtol=1e-5, atol=1e-6)
    k_full = max(1, int(ref_raw.size * 0.25))
    ref_full = jnp.mean(jax.lax.top_k(ref_raw, k_full)[0])
    assert jnp.allclose(loss_full, ref_full, rtol=1e-5, atol=1e-6)

    print("KERNEL_OK")
</pallas_src>

<mosaic_0001>
module attributes {stable_mosaic.version = 11 : i64} {
  func.func @_bce_sum_kernel(%arg0: i32, %arg1: memref<16x128xf32, #tpu.memory_space<vmem>>, %arg2: memref<16x128xf32, #tpu.memory_space<vmem>>, %arg3: memref<1x8x128xf32, #tpu.memory_space<vmem>>) attributes {dimension_semantics = [#tpu.dimension_semantics<parallel>], iteration_bounds = array<i64: 1>, scalar_prefetch = 0 : i64, scratch_operands = 0 : i64, tpu.core_type = #tpu.core_type<tc>, window_params = [{transform_indices = @transform_0, window_bounds = array<i64: 16, 128>}, {transform_indices = @transform_1, window_bounds = array<i64: 16, 128>}, {transform_indices = @transform_2, window_bounds = array<i64: 1, 8, 128>}]} {
    %c0 = arith.constant 0 : index
    %c0_0 = arith.constant 0 : index
    %0 = vector.load %arg1[%c0, %c0_0] : memref<16x128xf32, #tpu.memory_space<vmem>>, vector<16x128xf32>
    %c0_1 = arith.constant 0 : index
    %c0_2 = arith.constant 0 : index
    %1 = vector.load %arg2[%c0_1, %c0_2] : memref<16x128xf32, #tpu.memory_space<vmem>>, vector<16x128xf32>
    %cst = arith.constant 0.000000e+00 : f32
    %2 = vector.broadcast %cst : f32 to vector<16x128xf32>
    %3 = arith.maximumf %0, %2 : vector<16x128xf32>
    %4 = arith.mulf %0, %1 : vector<16x128xf32>
    %5 = arith.subf %3, %4 : vector<16x128xf32>
    %6 = math.absf %0 : vector<16x128xf32>
    %cst_3 = arith.constant 0.000000e+00 : f32
    %7 = vector.broadcast %cst_3 : f32 to vector<16x128xf32>
    %8 = arith.subf %7, %6 : vector<16x128xf32>
    %9 = math.exp %8 : vector<16x128xf32>
    %10 = math.log1p %9 : vector<16x128xf32>
    %11 = arith.addf %5, %10 : vector<16x128xf32>
    %12 = vector.shape_cast %11 : vector<16x128xf32> to vector<2x8x128xf32>
    %cst_4 = arith.constant dense<0.000000e+00> : vector<8x128xf32>
    %13 = vector.multi_reduction <add>, %12, %cst_4 [0] : vector<2x8x128xf32> to vector<8x128xf32>
    %c0_5 = arith.constant 0 : index
    %c0_6 = arith.constant 0 : index
    %c0_7 = arith.constant 0 : index
    %14 = vector.load %arg3[%c0_5, %c0_6, %c0_7] : memref<1x8x128xf32, #tpu.memory_space<vmem>>, vector<1x8x128xf32>
    %15 = vector.shape_cast %14 : vector<1x8x128xf32> to vector<8x128xf32>
    %16 = vector.shape_cast %13 : vector<8x128xf32> to vector<1x8x128xf32>
    tpu.vector_store %arg3[%c0_5, %c0_6, %c0_7], %16 {strides = array<i32>} : memref<1x8x128xf32, #tpu.memory_space<vmem>>, vector<1x8x128xf32>,
    return
  }
  func.func @transform_0(%arg0: i32) -> (i32, i32) {
    %c0_i32 = arith.constant 0 : i32
    %c0_i32_0 = arith.constant 0 : i32
    return %arg0, %c0_i32 : i32, i32
  }
  func.func @transform_1(%arg0: i32) -> (i32, i32) {
    %c0_i32 = arith.constant 0 : i32
    %c0_i32_0 = arith.constant 0 : i32
    return %arg0, %c0_i32 : i32, i32
  }
  func.func @transform_2(%arg0: i32) -> (i32, i32, i32) {
    %c0_i32 = arith.constant 0 : i32
    %c0_i32_0 = arith.constant 0 : i32
    %c0_i32_1 = arith.constant 0 : i32
    return %arg0, %c0_i32, %c0_i32_0 : i32, i32, i32
  }
}

</mosaic_0001>

<bundles_post_ra>
// kernel: tpu_custom_call.1
= control target key start
LH: loop header
LB: loop body
LE: loop exit
PB: predicated region body
PF: predicated region fallthrough
CT: control target
= control target key end

     0   :  { %7 = vsyncpa [#allocation3], 0  ;;  %s204_s0 = inlined_call_operand.hbm [shape: f32[16,128], index: 0, kind: input, shape index: {}]   ;;  %s205_s1 = inlined_call_operand.hbm [shape: f32[16,128], index: 1, kind: input, shape index: {}]   ;;  %s206_s2 = inlined_call_operand.hbm [shape: f32[1,8,128], index: 2, kind: output, shape index: {}]  }
   0x1   :  { %8 = vsyncpa [#allocation6], 0 }
   0x2   :  { %9 = vsyncpa [#allocation4], 0  ;;  %s175_s9 = smov [#allocation2]  }
   0x3   :  { %s15_s10 = sshll.u32 %s175_s9, 4  ;;  %s16_s10 = int_to_ptr.vmem [resolvable:$true] %s15_s10 }
   0x4   :  { %s117_s11 = scalar_lea.vmem %s16_s10, 256  ;;  %p122_p1 = scmp.lt.s32.totalorder %s16_s10, %s16_s10 }
   0x5   :  { %p118_p0 = scmp.ne.s32.totalorder %s16_s10, %s117_s11  ;;  %p123_p2 = scmp.lt.s32.totalorder %s117_s11, %s117_s11 }
   0x7   :  { %p124_p3 = por %p123_p2, %p122_p1 }
   0x9   :  { %p125_p4 = pnand %p124_p3, %p118_p0 }
   0xb   :  { %128 = shalt.err (!%p125_p4)
}
   0xc   :  { %s176_s12 = smov 128   ;;  %s177_s13 = smov 8  }
   0xd   :  { %21 = dma.hbm_to_vmem [thread:$0]  %s204_s0, 256, %s16_s10, [#allocation3], %s176_s12, %s176_s12, %s177_s13  }
   0xe   :  { %s178_s16 = smov [#allocation5]  }
   0xf   :  { %s27_s17 = sshll.u32 %s178_s16, 4  ;;  %s28_s17 = int_to_ptr.vmem [resolvable:$true] %s27_s17 }
  0x10   :  { %s137_s18 = scalar_lea.vmem %s28_s17, 256  ;;  %p142_p6 = scmp.lt.s32.totalorder %s28_s17, %s28_s17 }
  0x11   :  { %p138_p5 = scmp.ne.s32.totalorder %s28_s17, %s137_s18  ;;  %p143_p7 = scmp.lt.s32.totalorder %s137_s18, %s137_s18 }
  0x13   :  { %p144_p8 = por %p143_p7, %p142_p6 }
  0x15   :  { %p145_p9 = pnand %p144_p8, %p138_p5 }
  0x17   :  { %148 = shalt.err (!%p145_p9)
}
  0x18   :  { %33 = dma.hbm_to_vmem [thread:$0]  %s205_s1, 256, %s28_s17, [#allocation6], %s176_s12, %s176_s12, %s177_s13  }
  0x19   :  { %169 = dma.done.wait [#allocation3], 256  }
  0x1a   :  { %170 = vsyncadd [#allocation3], 4294967040 }
  0x1b   :  { %171 = dma.done.wait [#allocation6], 256  }
  0x1c   :  { %172 = vsyncadd [#allocation6], 4294967040  ;;  %v40_v0 = vld [vmem:[#allocation2] sm:$0xff]  ;;  %v41_v1 = vld [vmem:[#allocation2 + $0x8] sm:$0xff]  ;;  %s179_s0 = smov [#allocation7]  }
  0x1d   :  { %v50_v2 = vand.u32 2147483647, %v40_v0  ;;  %v51_v3 = vand.u32 2147483647, %v41_v1  ;;  %v42_v14 = vld [vmem:[#allocation5] sm:$0xff]  ;;  %v43_v15 = vld [vmem:[#allocation5 + $0x8] sm:$0xff] }
  0x1e   :  { %v44_v17 = vmax.f32 %v40_v0, 0.0  ;;  %v46_v18 = vmul.f32 %v42_v14, %v40_v0  ;;  %v45_v21 = vmax.f32 %v41_v1, 0.0  ;;  %v47_v22 = vmul.f32 %v43_v15, %v41_v1  ;;  %s86_s1 = sshll.u32 %s179_s0, 4  ;;  %s87_s1 = int_to_ptr.vmem [resolvable:$true] %s86_s1 }
  0x1f   :  { %v52_v4 = vsub.f32 0.0, %v50_v2  ;;  %v53_v5 = vsub.f32 0.0, %v51_v3  ;;  %s149_s21 = scalar_lea.vmem %s87_s1, 128  ;;  %p154_p11 = scmp.lt.s32.totalorder %s87_s1, %s87_s1 }
  0x20   :  { %v48_v26 = vsub.f32 %v44_v17, %v46_v18  ;;  %v49_v29 = vsub.f32 %v45_v21, %v47_v22  ;;  %p150_p10 = scmp.ne.s32.totalorder %s87_s1, %s149_s21  ;;  %p155_p12 = scmp.lt.s32.totalorder %s149_s21, %s149_s21 }
  0x21   :  { %v54_v6 = vmul.f32 1.442695, %v52_v4  ;;  %v56_v7 = vmul.f32 1.442695, %v53_v5 }
  0x22   :  { %p156_p13 = por %p155_p12, %p154_p11 }
  0x23   :  { %101 = vpow2.f32 %v54_v6 }
  0x24   :  { %103 = vpow2.f32 %v56_v7  ;;  %p157_p0 = pnand %p156_p13, %p150_p10 }
  0x30   :  { %v102_v8 = vpop.eup %101 }
  0x31   :  { %v104_v9 = vpop.eup %103  ;;  %v58_v10 = vadd.f32 1.0, %v102_v8  ;;  %v61_v12 = vmul.f32 -0.5, %v102_v8  ;;  %v64_v19 = vand.u32 2147483647, %v102_v8 }
  0x32   :  { %v67_v11 = vadd.f32 1.0, %v104_v9  ;;  %v70_v13 = vmul.f32 -0.5, %v104_v9  ;;  %v73_v23 = vand.u32 2147483647, %v104_v9 }
  0x33   :  { %105 = vlog2.f32 %v58_v10  ;;  %v62_v16 = vadd.f32 1.0, %v61_v12  ;;  %vm65_vm0 = vcmp.lt.f32.partialorder %v64_v19, 0.0004427343 }
  0x34   :  { %107 = vlog2.f32 %v67_v11  ;;  %v71_v20 = vadd.f32 1.0, %v70_v13  ;;  %vm74_vm1 = vcmp.lt.f32.partialorder %v73_v23, 0.0004427343 }
  0x35   :  { %v63_v24 = vmul.f32 %v102_v8, %v62_v16 }
  0x36   :  { %v72_v27 = vmul.f32 %v104_v9, %v71_v20 }
  0x40   :  { %v106_v25 = vpop.eup %105 }
  0x41   :  { %v108_v28 = vpop.eup %107  ;;  %v60_v30 = vmul.f32 0.6931472, %v106_v25 }
  0x42   :  { %v69_v31 = vmul.f32 0.6931472, %v108_v28 }
  0x43   :  { %v66_v32 = vsel %vm65_vm0, %v63_v24, %v60_v30 }
  0x44   :  { %v75_v33 = vsel %vm74_vm1, %v72_v27, %v69_v31  ;;  %v76_v34 = vadd.f32 %v66_v32, %v48_v26 }
  0x45   :  { %v77_v35 = vadd.f32 %v75_v33, %v49_v29 }
  0x47   :  { %v78_v36 = vadd.f32 %v77_v35, %v76_v34 }
  0x49   :  { %79 = vst [vmem:[#allocation7] sm:$0xff] %v78_v36 }
  0x4a   :  { %160 = shalt.err (!%p157_p0)
}
  0x4b   :  { %89 = dma.vmem_to_hbm [thread:$0]  %s87_s1, 128, %s206_s2, [#allocation4]  }
  0x4c   :  { %173 = dma.done.wait [#allocation4], 128  }
  0x4d   :  { %174 = vsyncadd [#allocation4], 4294967168 }
  0x4e   :  { %93 = vsyncpa [#allocation3], 1 }
  0x4f   :  { %94 = vsyncpa [#allocation6], 1 }
  0x50   :  { %95 = vsyncpa [#allocation4], 1 }

</bundles_post_ra>
